<compile_context>
chip_gen: v7x
topology: tpu7x:2x2x1
jax: 0.10.0
libtpu: 0.0.40
codegen_flags: <defaults>
</compile_context>

<pallas_src>
import functools

import jax
import jax.numpy as jnp
from jax.experimental import pallas as pl
from jax.experimental.pallas import tpu as pltpu


# ---------------------------------------------------------------------------
# Elementwise median helpers (pure VPU min/max networks).
# ---------------------------------------------------------------------------
def _sort3(a, b, c):
    """Elementwise 3-way sort: returns (min, median, max)."""
    lo1 = jnp.minimum(a, b)
    hi1 = jnp.maximum(a, b)
    lo2 = jnp.minimum(hi1, c)
    hi = jnp.maximum(hi1, c)
    lo = jnp.minimum(lo1, lo2)
    mid = jnp.maximum(lo1, lo2)
    return lo, mid, hi


def _median3(a, b, c):
    """Elementwise median of three (4 min/max ops)."""
    return jnp.maximum(jnp.minimum(a, b), jnp.minimum(jnp.maximum(a, b), c))


def _median3x3(up, mid, dn, hshift):
    """Exact median of the 3x3 neighborhood.

    `up`/`mid`/`dn` are the zero-padded vertical neighbors of every pixel;
    `hshift(a, dx)` shifts horizontally by dx with zero fill.  Each vertical
    column is sorted once and its stats reused for all horizontal offsets:
        med9 = med3( max(column mins), med3(column meds), min(column maxes) )
    """
    lo, mi, hi = _sort3(up, mid, dn)
    max_lo = jnp.maximum(jnp.maximum(hshift(lo, -1), lo), hshift(lo, 1))
    min_hi = jnp.minimum(jnp.minimum(hshift(hi, -1), hi), hshift(hi, 1))
    med_mi = _median3(hshift(mi, -1), mi, hshift(mi, 1))
    return _median3(max_lo, med_mi, min_hi)


def _median_of_windows(windows):
    """Lower median (torch.median) of a list of equal-shaped arrays.

    Partial bubble network: only enough passes to finalize rank (n-1)//2.
    """
    vals = list(windows)
    n = len(vals)
    m = (n - 1) // 2
    for i in range(n - m):
        for j in range(n - 1 - i):
            a, b = vals[j], vals[j + 1]
            vals[j] = jnp.minimum(a, b)
            vals[j + 1] = jnp.maximum(a, b)
    return vals[m]


# ---------------------------------------------------------------------------
# Kernel 1: small planes, flattened to lane-dense rows of length H*W.
# ---------------------------------------------------------------------------
def _median_blur_flat_kernel(x_ref, col_ref, o_ref, *, H, W, kh, kw):
    """x_ref / o_ref: (Cb, H*W) -- Cb planes per grid step.
    col_ref: (1, H*W) int32 column index of every flattened position."""
    x = x_ref[...]
    col = col_ref[...]
    cb = x.shape[0]
    L = H * W
    dt = x.dtype
    zero = jnp.zeros((), dt)
    ph, pw = (kh - 1) // 2, (kw - 1) // 2

    # Horizontal-neighbor validity masks: one compare per dx, hoisted and
    # reused across all vertical offsets / column statistics.
    hmask = {}
    for dx in range(-pw, kw - pw):
        if dx > 0:
            hmask[dx] = col < (W - dx)
        elif dx < 0:
            hmask[dx] = col >= (-dx)

    def vshift(a, dy):
        # value dy rows below (dy>0) / above (dy<0); zero outside the plane.
        d = dy * W
        if d == 0:
            return a
        if d > 0:
            return jnp.concatenate([a[:, d:], jnp.zeros((cb, d), dt)], axis=1)
        return jnp.concatenate([jnp.zeros((cb, -d), dt), a[:, : L + d]], axis=1)

    def hshift(a, dx):
        # value dx columns to the right (dx>0) / left (dx<0); zero where the
        # neighbor column falls outside the image row.
        if dx == 0:
            return a
        if dx > 0:
            shifted = jnp.concatenate(
                [a[:, dx:], jnp.zeros((cb, dx), dt)], axis=1)
        else:
            shifted = jnp.concatenate(
                [jnp.zeros((cb, -dx), dt), a[:, : L + dx]], axis=1)
        return jnp.where(hmask[dx], shifted, zero)

    if (kh, kw) == (3, 3):
        med = _median3x3(vshift(x, -1), x, vshift(x, 1), hshift)
    else:
        wins = []
        for dy in range(-ph, kh - ph):
            v = vshift(x, dy)
            for dx in range(-pw, kw - pw):
                wins.append(hshift(v, dx))
        med = _median_of_windows(wins)
    o_ref[...] = med.astype(o_ref.dtype)


# ---------------------------------------------------------------------------
# Kernel 2: wide planes, (plane-block, row-strip) grid.
# ---------------------------------------------------------------------------
def _median_blur_strip_kernel(x_ref, o_ref, scr_ref, *, H, W, kh, kw,
                              RS, TOP, PB):
    """x_ref: (Cb, H, W) full planes, VMEM-resident across all strips.
    o_ref: (Cb, RS, W) current output row strip (pipelined writeback).
    scr_ref: (Cb, TOP+H+PB, W) zero-padded copy of the planes, filled once per
    plane block; vertical neighbors are plain row slices of it, so only
    strip-sized temporaries are ever live."""
    j = pl.program_id(1)
    ph, pw = (kh - 1) // 2, (kw - 1) // 2
    cb = o_ref.shape[0]
    dt = o_ref.dtype

    @pl.when(j == 0)
    def _fill_padded_plane():
        # Zero only the halo rows; the interior is overwritten by the image.
        if TOP:
            scr_ref[:, :TOP, :] = jnp.zeros((cb, TOP, W), dt)
        if PB:
            scr_ref[:, TOP + H:, :] = jnp.zeros((cb, PB, W), dt)
        scr_ref[:, TOP:TOP + H, :] = x_ref[...]

    r0 = j * RS
    if RS % 8 == 0:
        r0 = pl.multiple_of(r0, 8)

    def vslice(dy):
        # rows [r0+dy, r0+dy+RS) of the zero-padded plane.
        return scr_ref[:, pl.ds(r0 + TOP + dy, RS), :]

    def hshift(a, dx):
        # shift along W with zero fill; the last axis is the image row, so the
        # zero fill is exactly the horizontal padding (no masks needed).
        if dx == 0:
            return a
        if dx > 0:
            return jnp.concatenate(
                [a[:, :, dx:], jnp.zeros((cb, RS, dx), dt)], axis=2)
        return jnp.concatenate(
            [jnp.zeros((cb, RS, -dx), dt), a[:, :, : W + dx]], axis=2)

    if (kh, kw) == (3, 3):
        med = _median3x3(vslice(-1), vslice(0), vslice(1), hshift)
    else:
        wins = []
        for dy in range(-ph, kh - ph):
            v = vslice(dy)
            for dx in range(-pw, kw - pw):
                wins.append(hshift(v, dx))
        med = _median_of_windows(wins)
    o_ref[...] = med.astype(o_ref.dtype)


# ---------------------------------------------------------------------------
# Wrapper.
# ---------------------------------------------------------------------------
def _vmem_capacity_bytes():
    try:
        cap = getattr(pltpu.get_tpu_info(), "vmem_capacity_bytes", None)
        if cap:
            return int(cap)
    except Exception:
        pass
    return 64 * 1024 * 1024  # conservative default (v7x per-core VMEM)


def _divisors_desc(n):
    return [d for d in range(n, 0, -1) if n % d == 0]


def median_blur(image, kernel_size=(3, 3)):
    """Median-blur a [B, C, H, W] image (zero padding, lower median)."""
    if image.ndim != 4:
        raise ValueError(f"Expected [B, C, H, W], got {image.shape}")
    kh, kw = int(kernel_size[0]), int(kernel_size[1])
    if kh < 1 or kw < 1 or kh % 2 == 0 or kw % 2 == 0:
        raise ValueError("kernel_size entries must be positive and odd")
    B, C, H, W = image.shape
    N = B * C
    dt = image.dtype
    dsize = jnp.dtype(dt).itemsize

    cap = _vmem_capacity_bytes()
    vmem_limit = (cap * 3) // 4
    budget = cap // 4                                   # working-set target
    plane_bytes = H * W * dsize
    n_tmp = 12 if (kh, kw) == (3, 3) else kh * kw + 6   # live temporaries

    # ---- small-plane path: lane-dense flattened planes ---------------------
    if W < 128 and n_tmp * plane_bytes <= budget:
        cb = 0
        for d in _divisors_desc(N):
            # sublane dim of the block must be the full dim or a multiple of 8
            if (d == N or d % 8 == 0) and n_tmp * d * plane_bytes <= budget:
                cb = d
                break
        if cb:
            L = H * W
            xf = image.reshape(N, L)          # free reshape, no extra HBM pass
            col_ids = (jnp.arange(L, dtype=jnp.int32) % W).reshape(1, L)
            kernel = functools.partial(
                _median_blur_flat_kernel, H=H, W=W, kh=kh, kw=kw)
            out = pl.pallas_call(
                kernel,
                out_shape=jax.ShapeDtypeStruct((N, L), dt),
                grid_spec=pltpu.PrefetchScalarGridSpec(
                    num_scalar_prefetch=0,
                    grid=(N // cb,),
                    in_specs=[
                        pl.BlockSpec((cb, L), lambda i: (i, 0)),
                        pl.BlockSpec((1, L), lambda i: (0, 0)),
                    ],
                    out_specs=pl.BlockSpec((cb, L), lambda i: (i, 0)),
                ),
                compiler_params=pltpu.CompilerParams(
                    dimension_semantics=("parallel",),
                    vmem_limit_bytes=vmem_limit),
            )(xf, col_ids)
            return out.reshape(B, C, H, W)

    # ---- general path: (plane block, row strip) grid ------------------------
    ph = (kh - 1) // 2
    pb = kh - 1 - ph
    x = image.reshape(N, H, W)

    cb = 1
    for d in _divisors_desc(N):
        if 4 * d * plane_bytes <= budget:
            cb = d
            break

    rs_cands = [d for d in _divisors_desc(H) if d % 8 == 0]
    rs = H
    for d in rs_cands:
        if n_tmp * cb * d * W * dsize <= budget // 2:
            rs = d
            break
    else:
        if rs_cands:
            rs = rs_cands[-1]
    # TODO(synk): planes whose full (H, W) slab does not fit the VMEM budget
    # would additionally need column tiling; not implemented here.

    top = ((ph + 7) // 8) * 8               # sublane-aligned top padding rows
    scr_rows = top + H + pb
    kernel = functools.partial(
        _median_blur_strip_kernel, H=H, W=W, kh=kh, kw=kw,
        RS=rs, TOP=top, PB=pb)
    out = pl.pallas_call(
        kernel,
        out_shape=jax.ShapeDtypeStruct((N, H, W), dt),
        grid_spec=pltpu.PrefetchScalarGridSpec(
            num_scalar_prefetch=0,
            grid=(N // cb, H // rs),
            in_specs=[pl.BlockSpec((cb, H, W), lambda i, j: (i, 0, 0))],
            out_specs=pl.BlockSpec((cb, rs, W), lambda i, j: (i, j, 0)),
            scratch_shapes=[pltpu.VMEM((cb, scr_rows, W), dt)],
        ),
        compiler_params=pltpu.CompilerParams(
            # strip axis is "arbitrary": the padded-plane scratch is filled at
            # the first strip of each plane block and reused by later strips.
            dimension_semantics=("parallel", "arbitrary"),
            vmem_limit_bytes=vmem_limit),
    )(x)
    return out.reshape(B, C, H, W)


class MedianBlur:
    """Pallas counterpart of torchkit's MedianBlur module (forward only)."""

    def __init__(self, kernel_size=(3, 3)):
        self.kernel_size = (int(kernel_size[0]), int(kernel_size[1]))

    def __call__(self, image):
        return median_blur(image, self.kernel_size)


# ---------------------------------------------------------------------------
# Pure-JAX reference mirroring the PyTorch semantics exactly.
# ---------------------------------------------------------------------------
def _median_blur_ref(image, kernel_size=(3, 3)):
    kh, kw = kernel_size
    ph, pw = (kh - 1) // 2, (kw - 1) // 2
    B, C, H, W = image.shape
    xp = jnp.pad(image, ((0, 0), (0, 0), (ph, ph), (pw, pw)))
    windows = []
    for dy in range(kh):
        for dx in range(kw):
            windows.append(xp[:, :, dy:dy + H, dx:dx + W])
    feats = jnp.stack(windows, axis=2)              # (B, C, kh*kw, H, W)
    srt = jnp.sort(feats, axis=2)
    n = kh * kw
    return srt[:, :, (n - 1) // 2]                  # torch lower median


if __name__ == "__main__":
    key = jax.random.PRNGKey(0)
    k1, k2 = jax.random.split(key)

    # Canonical small case (module test shape) -> lane-dense flat kernel, 3x3.
    x1 = jax.random.uniform(k1, (2, 4, 16, 16), dtype=jnp.float32)
    y1 = MedianBlur((3, 3))(x1)
    jax.block_until_ready(y1)
    r1 = _median_blur_ref(x1, (3, 3))
    assert y1.shape == x1.shape, y1.shape
    assert jnp.allclose(y1, r1, atol=1e-6, rtol=1e-6), float(
        jnp.max(jnp.abs(y1 - r1)))

    # Same small case with a 5x5 kernel -> partial-bubble median selection.
    y1b = median_blur(x1, (5, 5))
    jax.block_until_ready(y1b)
    r1b = _median_blur_ref(x1, (5, 5))
    assert y1b.shape == x1.shape, y1b.shape
    assert jnp.allclose(y1b, r1b, atol=1e-6, rtol=1e-6), float(
        jnp.max(jnp.abs(y1b - r1b)))

    # Wide case -> (plane-block, row-strip) kernel.
    x2 = jax.random.uniform(k2, (1, 2, 16, 128), dtype=jnp.float32)
    y2 = median_blur(x2, (3, 3))
    jax.block_until_ready(y2)
    r2 = _median_blur_ref(x2, (3, 3))
    assert y2.shape == x2.shape, y2.shape
    assert jnp.allclose(y2, r2, atol=1e-6, rtol=1e-6), float(
        jnp.max(jnp.abs(y2 - r2)))

    print("KERNEL_OK")
</pallas_src>

<mosaic_0001>
module attributes {stable_mosaic.version = 11 : i64} {
  func.func @_median_blur_flat_kernel(%arg0: i32, %arg1: memref<8x256xf32, #tpu.memory_space<vmem>>, %arg2: memref<1x256xi32, #tpu.memory_space<vmem>>, %arg3: memref<8x256xf32, #tpu.memory_space<vmem>>) attributes {dimension_semantics = [#tpu.dimension_semantics<parallel>], iteration_bounds = array<i64: 1>, scalar_prefetch = 0 : i64, scratch_operands = 0 : i64, tpu.core_type = #tpu.core_type<tc>, window_params = [{transform_indices = @transform_0, window_bounds = array<i64: 8, 256>}, {pipeline_mode = #tpu.pipeline_mode<synchronous>, transform_indices = @transform_1, window_bounds = array<i64: 1, 256>}, {transform_indices = @transform_2, window_bounds = array<i64: 8, 256>}]} {
    %c0 = arith.constant 0 : index
    %c0_0 = arith.constant 0 : index
    %0 = vector.load %arg1[%c0, %c0_0] : memref<8x256xf32, #tpu.memory_space<vmem>>, vector<8x256xf32>
    %c0_1 = arith.constant 0 : index
    %c0_2 = arith.constant 0 : index
    %1 = vector.load %arg2[%c0_1, %c0_2] : memref<1x256xi32, #tpu.memory_space<vmem>>, vector<1x256xi32>
    %c1_i32 = arith.constant 1 : i32
    %2 = vector.broadcast %c1_i32 : i32 to vector<1x256xi32>
    %3 = arith.cmpi sge, %1, %2 : vector<1x256xi32>
    %c15_i32 = arith.constant 15 : i32
    %4 = vector.broadcast %c15_i32 : i32 to vector<1x256xi32>
    %5 = arith.cmpi slt, %1, %4 : vector<1x256xi32>
    %cst = arith.constant 0.000000e+00 : f32
    %6 = vector.broadcast %cst : f32 to vector<8x16xf32>
    %7 = vector.extract_strided_slice %0 {offsets = [0, 0], sizes = [8, 240], strides = [1, 1]} : vector<8x256xf32> to vector<8x240xf32>
    %8 = tpu.concatenate %6, %7 in 1 : vector<8x16xf32>, vector<8x240xf32> -> vector<8x256xf32>
    %9 = vector.extract_strided_slice %0 {offsets = [0, 16], sizes = [8, 240], strides = [1, 1]} : vector<8x256xf32> to vector<8x240xf32>
    %cst_3 = arith.constant 0.000000e+00 : f32
    %10 = vector.broadcast %cst_3 : f32 to vector<8x16xf32>
    %11 = tpu.concatenate %9, %10 in 1 : vector<8x240xf32>, vector<8x16xf32> -> vector<8x256xf32>
    %12 = arith.minimumf %8, %0 : vector<8x256xf32>
    %13 = arith.maximumf %8, %0 : vector<8x256xf32>
    %14 = arith.minimumf %13, %11 : vector<8x256xf32>
    %15 = arith.maximumf %13, %11 : vector<8x256xf32>
    %16 = arith.minimumf %12, %14 : vector<8x256xf32>
    %17 = arith.maximumf %12, %14 : vector<8x256xf32>
    %cst_4 = arith.constant 0.000000e+00 : f32
    %18 = vector.broadcast %cst_4 : f32 to vector<8x1xf32>
    %19 = vector.extract_strided_slice %16 {offsets = [0, 0], sizes = [8, 255], strides = [1, 1]} : vector<8x256xf32> to vector<8x255xf32>
    %20 = tpu.concatenate %18, %19 in 1 : vector<8x1xf32>, vector<8x255xf32> -> vector<8x256xf32>
    %cst_5 = arith.constant 0.000000e+00 : f32
    %21 = vector.shape_cast %3 : vector<1x256xi1> to vector<1x256xi1>
    %22 = vector.broadcast %21 : vector<1x256xi1> to vector<8x256xi1>
    %23 = vector.broadcast %cst_5 : f32 to vector<8x256xf32>
    %24 = arith.select %22, %20, %23 : vector<8x256xi1>, vector<8x256xf32>
    %25 = arith.maximumf %24, %16 : vector<8x256xf32>
    %26 = vector.extract_strided_slice %16 {offsets = [0, 1], sizes = [8, 255], strides = [1, 1]} : vector<8x256xf32> to vector<8x255xf32>
    %cst_6 = arith.constant 0.000000e+00 : f32
    %27 = vector.broadcast %cst_6 : f32 to vector<8x1xf32>
    %28 = tpu.concatenate %26, %27 in 1 : vector<8x255xf32>, vector<8x1xf32> -> vector<8x256xf32>
    %cst_7 = arith.constant 0.000000e+00 : f32
    %29 = vector.shape_cast %5 : vector<1x256xi1> to vector<1x256xi1>
    %30 = vector.broadcast %29 : vector<1x256xi1> to vector<8x256xi1>
    %31 = vector.broadcast %cst_7 : f32 to vector<8x256xf32>
    %32 = arith.select %30, %28, %31 : vector<8x256xi1>, vector<8x256xf32>
    %33 = arith.maximumf %25, %32 : vector<8x256xf32>
    %cst_8 = arith.constant 0.000000e+00 : f32
    %34 = vector.broadcast %cst_8 : f32 to vector<8x1xf32>
    %35 = vector.extract_strided_slice %15 {offsets = [0, 0], sizes = [8, 255], strides = [1, 1]} : vector<8x256xf32> to vector<8x255xf32>
    %36 = tpu.concatenate %34, %35 in 1 : vector<8x1xf32>, vector<8x255xf32> -> vector<8x256xf32>
    %cst_9 = arith.constant 0.000000e+00 : f32
    %37 = vector.shape_cast %3 : vector<1x256xi1> to vector<1x256xi1>
    %38 = vector.broadcast %37 : vector<1x256xi1> to vector<8x256xi1>
    %39 = vector.broadcast %cst_9 : f32 to vector<8x256xf32>
    %40 = arith.select %38, %36, %39 : vector<8x256xi1>, vector<8x256xf32>
    %41 = arith.minimumf %40, %15 : vector<8x256xf32>
    %42 = vector.extract_strided_slice %15 {offsets = [0, 1], sizes = [8, 255], strides = [1, 1]} : vector<8x256xf32> to vector<8x255xf32>
    %cst_10 = arith.constant 0.000000e+00 : f32
    %43 = vector.broadcast %cst_10 : f32 to vector<8x1xf32>
    %44 = tpu.concatenate %42, %43 in 1 : vector<8x255xf32>, vector<8x1xf32> -> vector<8x256xf32>
    %cst_11 = arith.constant 0.000000e+00 : f32
    %45 = vector.shape_cast %5 : vector<1x256xi1> to vector<1x256xi1>
    %46 = vector.broadcast %45 : vector<1x256xi1> to vector<8x256xi1>
    %47 = vector.broadcast %cst_11 : f32 to vector<8x256xf32>
    %48 = arith.select %46, %44, %47 : vector<8x256xi1>, vector<8x256xf32>
    %49 = arith.minimumf %41, %48 : vector<8x256xf32>
    %cst_12 = arith.constant 0.000000e+00 : f32
    %50 = vector.broadcast %cst_12 : f32 to vector<8x1xf32>
    %51 = vector.extract_strided_slice %17 {offsets = [0, 0], sizes = [8, 255], strides = [1, 1]} : vector<8x256xf32> to vector<8x255xf32>
    %52 = tpu.concatenate %50, %51 in 1 : vector<8x1xf32>, vector<8x255xf32> -> vector<8x256xf32>
    %cst_13 = arith.constant 0.000000e+00 : f32
    %53 = vector.shape_cast %3 : vector<1x256xi1> to vector<1x256xi1>
    %54 = vector.broadcast %53 : vector<1x256xi1> to vector<8x256xi1>
    %55 = vector.broadcast %cst_13 : f32 to vector<8x256xf32>
    %56 = arith.select %54, %52, %55 : vector<8x256xi1>, vector<8x256xf32>
    %57 = vector.extract_strided_slice %17 {offsets = [0, 1], sizes = [8, 255], strides = [1, 1]} : vector<8x256xf32> to vector<8x255xf32>
    %cst_14 = arith.constant 0.000000e+00 : f32
    %58 = vector.broadcast %cst_14 : f32 to vector<8x1xf32>
    %59 = tpu.concatenate %57, %58 in 1 : vector<8x255xf32>, vector<8x1xf32> -> vector<8x256xf32>
    %cst_15 = arith.constant 0.000000e+00 : f32
    %60 = vector.shape_cast %5 : vector<1x256xi1> to vector<1x256xi1>
    %61 = vector.broadcast %60 : vector<1x256xi1> to vector<8x256xi1>
    %62 = vector.broadcast %cst_15 : f32 to vector<8x256xf32>
    %63 = arith.select %61, %59, %62 : vector<8x256xi1>, vector<8x256xf32>
    %64 = arith.minimumf %56, %17 : vector<8x256xf32>
    %65 = arith.maximumf %56, %17 : vector<8x256xf32>
    %66 = arith.minimumf %65, %63 : vector<8x256xf32>
    %67 = arith.maximumf %64, %66 : vector<8x256xf32>
    %68 = arith.minimumf %33, %67 : vector<8x256xf32>
    %69 = arith.maximumf %33, %67 : vector<8x256xf32>
    %70 = arith.minimumf %69, %49 : vector<8x256xf32>
    %71 = arith.maximumf %68, %70 : vector<8x256xf32>
    %c0_16 = arith.constant 0 : index
    %c0_17 = arith.constant 0 : index
    %72 = vector.load %arg3[%c0_16, %c0_17] : memref<8x256xf32, #tpu.memory_space<vmem>>, vector<8x256xf32>
    tpu.vector_store %arg3[%c0_16, %c0_17], %71 {strides = array<i32>} : memref<8x256xf32, #tpu.memory_space<vmem>>, vector<8x256xf32>,
    return
  }
  func.func @transform_0(%arg0: i32) -> (i32, i32) {
    %c0_i32 = arith.constant 0 : i32
    %c0_i32_0 = arith.constant 0 : i32
    return %arg0, %c0_i32 : i32, i32
  }
  func.func @transform_1(%arg0: i32) -> (i32, i32) {
    %c0_i32 = arith.constant 0 : i32
    %c0_i32_0 = arith.constant 0 : i32
    %c0_i32_1 = arith.constant 0 : i32
    return %c0_i32, %c0_i32_0 : i32, i32
  }
  func.func @transform_2(%arg0: i32) -> (i32, i32) {
    %c0_i32 = arith.constant 0 : i32
    %c0_i32_0 = arith.constant 0 : i32
    return %arg0, %c0_i32 : i32, i32
  }
}

</mosaic_0001>

<bundles_post_ra>
// kernel: tpu_custom_call.1
= control target key start
LH: loop header
LB: loop body
LE: loop exit
PB: predicated region body
PF: predicated region fallthrough
CT: control target
= control target key end

     0   :  { %7 = vsyncpa [#allocation3], 0  ;;  %s346_s0 = inlined_call_operand.hbm [shape: f32[8,256], index: 0, kind: input, shape index: {}]   ;;  %s347_s1 = inlined_call_operand.vmem [shape: s32[1,256], index: 1, kind: input, shape index: {}]   ;;  %s348_s2 = inlined_call_operand.hbm [shape: f32[8,256], index: 2, kind: output, shape index: {}]  }
   0x1   :  { %8 = vsyncpa [#allocation4], 0  ;;  %s247_s9 = smov [#allocation2]   ;;  %s199_s13 = scalar_lea.hbm %s346_s0, 256 }
   0x2   :  { %s15_s10 = sshll.u32 %s247_s9, 4  ;;  %p200_p0 = scmp.ne.s32.totalorder %s346_s0, %s199_s13  ;;  %s16_s10 = int_to_ptr.vmem [resolvable:$true] %s15_s10 }
   0x3   :  { %p203_p1 = scmp.lt.u32.totalorder %s199_s13, %s346_s0 }
   0x5   :  { %p205_p2 = pnand %p203_p1, %p200_p0 }
   0x7   :  { %208 = shalt.err (!%p205_p2)
}
   0x8   :  { %s209_s18 = scalar_lea.vmem %s16_s10, 256  ;;  %p214_p4 = scmp.lt.s32.totalorder %s16_s10, %s16_s10 }
   0x9   :  { %p210_p3 = scmp.ne.s32.totalorder %s16_s10, %s209_s18  ;;  %p215_p5 = scmp.lt.s32.totalorder %s209_s18, %s209_s18 }
   0xb   :  { %p216_p6 = por %p215_p5, %p214_p4 }
   0xd   :  { %p217_p7 = pnand %p216_p6, %p210_p3 }
   0xf   :  { %220 = shalt.err (!%p217_p7)
}
  0x10   :  { %18 = dma.hbm_to_vmem [thread:$0]  %s346_s0, 256, %s16_s10, [#allocation3]  }
  0x11   :  { %243 = dma.done.wait [#allocation3], 256  }
  0x12   :  { %244 = vsyncadd [#allocation3], 4294967040  ;;  %v24_v0 = vld [vmem:[#allocation2] sm:$0xff]  ;;  %s248_s21 = smov 112   ;;  %s249_s22 = smov 16   ;;  %v25_v1 = vld [vmem:[#allocation2 + $0x8] sm:$0xff]  ;;  %v73_v22 = vlaneseq }
  0x13   :  { %40 = vrot.lane.b32.xlu1 %v24_v0, %s248_s21  ;;  %31 = vrot.lane.b32.xlu0 %v24_v0, %s249_s22  ;;  %vm35_vm0 = vcmask 130048   ;;  %vm44_vm1 = vcmask 916480   ;;  %s250_s0 = smov 1   ;;  %s251_s23 = smov 127   ;;  %v26_v23 = vld [vmem:[%s347_s1] sm:$0x3] }
  0x14   :  { %v74_v25 = vshrl.u32 %v73_v22, 7  ;;  %vm27_vm2 = vcmp.ge.s32.totalorder %v26_v23, 1  ;;  %vm28_vm3 = vcmp.lt.s32.totalorder %v26_v23, 15  ;;  %v252_v30 = vmov 0   ;;  %s253_s1 = smov [#allocation5]  }
  0x15   :  { %v72_v31 = vsel %vm27_vm2, 1, %v252_v30  ;;  %v96_v33 = vsel %vm28_vm3, 1, %v252_v30  ;;  %vm67_vm4 = vcmask 7168   ;;  %vm91_vm5 = vcmask 1039360   ;;  %s183_s26 = sshll.u32 %s253_s1, 4  ;;  %s184_s26 = int_to_ptr.vmem [resolvable:$true] %s183_s26 }
  0x16   :  { %v75_v28 = vsub.s32 0, %v74_v25  ;;  %v79_v29 = vsub.s32 1, %v74_v25  ;;  %s221_s27 = scalar_lea.vmem %s184_s26, 256  ;;  %p226_p9 = scmp.lt.s32.totalorder %s184_s26, %s184_s26 }
  0x17   :  { %42 = vrot.lane.b32.xlu1 %v25_v1, %s248_s21  ;;  %33 = vrot.lane.b32.xlu0 %v25_v1, %s249_s22  ;;  %p222_p8 = scmp.ne.s32.totalorder %s184_s26, %s221_s27  ;;  %p227_p10 = scmp.lt.s32.totalorder %s221_s27, %s221_s27 }
  0x18   :  { %v76_v35 = vrot.slane %v72_v31, %v75_v28  ;;  %v80_v36 = vrot.slane %v72_v31, %v79_v29  ;;  %v100_v38 = vrot.slane %v96_v33, %v75_v28  ;;  %v104_v39 = vrot.slane %v96_v33, %v79_v29 }
  0x19   :  { %p228_p11 = por %p227_p10, %p226_p9 }
  0x1a   :  { %vm81_vm6 = vcmp.eq.s32.totalorder %v76_v35, 1  ;;  %vm82_vm7 = vcmp.eq.s32.totalorder %v80_v36, 1  ;;  %vm105_vm8 = vcmp.eq.s32.totalorder %v100_v38, 1  ;;  %vm106_vm9 = vcmp.eq.s32.totalorder %v104_v39, 1 }
  0x1b   :  { %p229_p12 = pnand %p228_p11, %p222_p8 }
  0x85   :  { %v41_v2 = vpop.permute.xlu1 %40  ;;  %v32_v3 = vpop.permute.xlu0 %31 }
  0x86   :  { %v39_v4 = vsel %vm35_vm0, 0.0, %v32_v3 }
  0x87   :  { %v51_v5 = vmax.f32 %v39_v4, %v24_v0  ;;  %v49_v14 = vmin.f32 %v39_v4, %v24_v0 }
  0x89   :  { %v43_v6 = vpop.permute.xlu1 %42  ;;  %v34_v7 = vpop.permute.xlu0 %33 }
  0x8a   :  { %v45_v8 = vsel %vm44_vm1, %v41_v2, %v43_v6  ;;  %v48_v9 = vsel %vm44_vm1, %v43_v6, 0.0  ;;  %v36_v10 = vsel %vm35_vm0, %v32_v3, %v34_v7 }
  0x8b   :  { %v53_v11 = vmin.f32 %v51_v5, %v45_v8  ;;  %v281_v12 = vmax.f32 %v51_v5, %v45_v8  ;;  %v52_v13 = vmax.f32 %v36_v10, %v25_v1  ;;  %v50_v18 = vmin.f32 %v36_v10, %v25_v1 }
  0x8d   :  { %v54_v15 = vmin.f32 %v52_v13, %v48_v9  ;;  %113 = vrot.lane.b32.xlu0 %v281_v12, %s250_s0  ;;  %v284_v16 = vmax.f32 %v52_v13, %v48_v9  ;;  %v286_v17 = vmax.f32 %v49_v14, %v53_v11  ;;  %v293_v20 = vmin.f32 %v49_v14, %v53_v11 }
  0x8f   :  { %115 = vrot.lane.b32.xlu1 %v284_v16, %s250_s0  ;;  %v289_v19 = vmax.f32 %v50_v18, %v54_v15  ;;  %v296_v21 = vmin.f32 %v50_v18, %v54_v15 }
  0x91   :  { %139 = vrot.lane.b32.xlu0 %v286_v17, %s250_s0 }
  0x93   :  { %141 = vrot.lane.b32.xlu1 %v289_v19, %s250_s0 }
  0x95   :  { %63 = vrot.lane.b32.xlu0 %v293_v20, %s250_s0 }
  0x97   :  { %65 = vrot.lane.b32.xlu1 %v296_v21, %s250_s0 }
  0x99   :  { %149 = vrot.lane.b32.xlu0 %v286_v17, %s251_s23 }
  0x9b   :  { %151 = vrot.lane.b32.xlu1 %v289_v19, %s251_s23 }
  0x9d   :  { %87 = vrot.lane.b32.xlu0 %v293_v20, %s251_s23 }
  0x9f   :  { %89 = vrot.lane.b32.xlu1 %v296_v21, %s251_s23 }
  0xa1   :  { %125 = vrot.lane.b32.xlu0 %v281_v12, %s251_s23 }
  0xa3   :  { %127 = vrot.lane.b32.xlu1 %v284_v16, %s251_s23 }
  0xff   :  { %v114_v24 = vpop.permute.xlu0 %113 }
 0x100   :  { %v120_v45 = vsel %vm67_vm4, 0.0, %v114_v24 }
 0x101   :  { %v116_v26 = vpop.permute.xlu1 %115  ;;  %v121_v57 = vsel %vm81_vm6, %v120_v45, 0.0 }
 0x102   :  { %v117_v46 = vsel %vm67_vm4, %v114_v24, %v116_v26  ;;  %v123_v11 = vmin.f32 %v121_v57, %v281_v12 }
 0x103   :  { %v140_v27 = vpop.permute.xlu0 %139  ;;  %v122_v58 = vsel %vm82_vm7, %v117_v46, 0.0 }
 0x104   :  { %v146_v40 = vsel %vm67_vm4, 0.0, %v140_v27  ;;  %v124_v13 = vmin.f32 %v122_v58, %v284_v16 }
 0x105   :  { %v142_v32 = vpop.permute.xlu1 %141  ;;  %v147_v48 = vsel %vm81_vm6, %v146_v40, 0.0 }
 0x106   :  { %v143_v41 = vsel %vm67_vm4, %v140_v27, %v142_v32  ;;  %v161_v59 = vmax.f32 %v147_v48, %v286_v17  ;;  %v159_v6 = vmin.f32 %v147_v48, %v286_v17 }
 0x107   :  { %v64_v34 = vpop.permute.xlu0 %63  ;;  %v148_v49 = vsel %vm82_vm7, %v143_v41, 0.0 }
 0x108   :  { %v71_v43 = vsel %vm67_vm4, 0.0, %v64_v34  ;;  %v162_v60 = vmax.f32 %v148_v49, %v289_v19  ;;  %v160_v7 = vmin.f32 %v148_v49, %v289_v19 }
 0x109   :  { %v66_v37 = vpop.permute.xlu1 %65  ;;  %v83_v52 = vsel %vm81_vm6, %v71_v43, 0.0 }
 0x10a   :  { %v68_v44 = vsel %vm67_vm4, %v64_v34, %v66_v37  ;;  %v85_v62 = vmax.f32 %v83_v52, %v293_v20 }
 0x10b   :  { %v150_v42 = vpop.permute.xlu0 %149  ;;  %v84_v53 = vsel %vm82_vm7, %v68_v44, 0.0 }
 0x10c   :  { %v86_v63 = vmax.f32 %v84_v53, %v296_v21 }
 0x10d   :  { %v152_v47 = vpop.permute.xlu1 %151 }
 0x10e   :  { %v153_v50 = vsel %vm91_vm5, %v150_v42, %v152_v47  ;;  %v156_v51 = vsel %vm91_vm5, %v152_v47, 0.0 }
 0x10f   :  { %v157_v54 = vsel %vm105_vm8, %v153_v50, 0.0  ;;  %v158_v55 = vsel %vm106_vm9, %v156_v51, 0.0  ;;  %v88_v56 = vpop.permute.xlu0 %87 }
 0x110   :  { %v163_v2 = vmin.f32 %v161_v59, %v157_v54  ;;  %v164_v3 = vmin.f32 %v162_v60, %v158_v55 }
 0x111   :  { %v90_v61 = vpop.permute.xlu1 %89 }
 0x112   :  { %v92_v0 = vsel %vm91_vm5, %v88_v56, %v90_v61  ;;  %v95_v1 = vsel %vm91_vm5, %v90_v61, 0.0  ;;  %v165_v15 = vmax.f32 %v159_v6, %v163_v2  ;;  %v166_v18 = vmax.f32 %v160_v7, %v164_v3 }
 0x113   :  { %v107_v4 = vsel %vm105_vm8, %v92_v0, 0.0  ;;  %v108_v5 = vsel %vm106_vm9, %v95_v1, 0.0  ;;  %v126_v14 = vpop.permute.xlu0 %125 }
 0x114   :  { %v109_v8 = vmax.f32 %v85_v62, %v107_v4  ;;  %v110_v9 = vmax.f32 %v86_v63, %v108_v5 }
 0x115   :  { %v128_v10 = vpop.permute.xlu1 %127 }
 0x116   :  { %v129_v20 = vsel %vm91_vm5, %v126_v14, %v128_v10  ;;  %v132_v21 = vsel %vm91_vm5, %v128_v10, 0.0  ;;  %v169_v23 = vmax.f32 %v109_v8, %v165_v15  ;;  %v170_v19 = vmax.f32 %v110_v9, %v166_v18 }
 0x117   :  { %v133_v22 = vsel %vm105_vm8, %v129_v20, 0.0  ;;  %v134_v17 = vsel %vm106_vm9, %v132_v21, 0.0  ;;  %v167_v12 = vmin.f32 %v109_v8, %v165_v15  ;;  %v168_v26 = vmin.f32 %v110_v9, %v166_v18 }
 0x118   :  { %v135_v24 = vmin.f32 %v123_v11, %v133_v22  ;;  %v136_v25 = vmin.f32 %v124_v13, %v134_v17 }
 0x11a   :  { %v171_v16 = vmin.f32 %v169_v23, %v135_v24  ;;  %v172_v27 = vmin.f32 %v170_v19, %v136_v25 }
 0x11c   :  { %v173_v28 = vmax.f32 %v167_v12, %v171_v16  ;;  %v174_v29 = vmax.f32 %v168_v26, %v172_v27 }
 0x11e   :  { %175 = vst [vmem:[#allocation5] sm:$0xff] %v173_v28  ;;  %176 = vst [vmem:[#allocation5 + $0x8] sm:$0xff] %v174_v29 }
 0x11f   :  { %232 = shalt.err (!%p229_p12)
}
 0x120   :  { %s233_s30 = scalar_lea.hbm %s348_s2, 256 }
 0x121   :  { %p234_p13 = scmp.ne.s32.totalorder %s348_s2, %s233_s30  ;;  %p237_p0 = scmp.lt.u32.totalorder %s233_s30, %s348_s2 }
 0x123   :  { %p239_p1 = pnand %p237_p0, %p234_p13 }
 0x125   :  { %242 = shalt.err (!%p239_p1)
}
 0x126   :  { %186 = dma.vmem_to_hbm [thread:$0]  %s184_s26, 256, %s348_s2, [#allocation4]  }
 0x127   :  { %245 = dma.done.wait [#allocation4], 256  }
 0x128   :  { %246 = vsyncadd [#allocation4], 4294967040 }
 0x129   :  { %190 = vsyncpa [#allocation3], 1 }
 0x12a   :  { %191 = vsyncpa [#allocation4], 1 }

</bundles_post_ra>
